<compile_context>
chip_gen: v7x
topology: tpu7x:2x2x1
jax: 0.10.0
libtpu: 0.0.40
codegen_flags: <defaults>
</compile_context>

<pallas_src>
import functools

import jax
import jax.numpy as jnp
from jax import lax
from jax.experimental import pallas as pl
from jax.experimental.pallas import tpu as pltpu


def _simclr_kernel(img_ref, txt_hbm, out_ref,
                   txtn_ref, col_ref, dsum_ref, rlog_ref, dma_sem,
                   *opt_stage, temp, batch):
    i = pl.program_id(0)
    nt = pl.num_programs(0)

    inv_temp = jnp.float32(1.0 / temp)
    eps_sq = jnp.float32(1e-24)  # (1e-12)^2 -> matches F.normalize eps on ||x||

    # staging buffer for the raw text DMA; alias txtn when dtypes match
    stage_ref = opt_stage[0] if opt_stage else txtn_ref

    # ---- first tile: DMA text HBM->VMEM, normalize once into mm dtype,
    #      zero all accumulators.
    @pl.when(i == 0)
    def _init():
        cp = pltpu.make_async_copy(txt_hbm, stage_ref, dma_sem)
        cp.start()
        cp.wait()
        txt = stage_ref[...].astype(jnp.float32)                       # (B, D)
        t_ss = jnp.sum(txt * txt, axis=1, keepdims=True)
        txtn_ref[...] = (txt * lax.rsqrt(jnp.maximum(t_ss, eps_sq))
                         ).astype(txtn_ref.dtype)
        col_ref[...] = jnp.zeros_like(col_ref)
        dsum_ref[...] = jnp.zeros_like(dsum_ref)
        rlog_ref[...] = jnp.zeros_like(rlog_ref)

    # ---- this tile's image rows: single scaled multiply into the MXU dtype,
    #      1/temp folded into the normalization scale.
    img = img_ref[...]                                                  # (tb, D)
    tb = img.shape[0]
    img_f = img.astype(jnp.float32)
    i_ss = jnp.sum(img_f * img_f, axis=1, keepdims=True)
    scale = lax.rsqrt(jnp.maximum(i_ss, eps_sq)) * inv_temp             # (tb, 1)
    img_mm = (img_f * scale).astype(txtn_ref.dtype)                     # (tb, D)

    row0 = pl.multiple_of(i * tb, tb)

    # positive-pair logits (= log(pos)): <img_mm[r], txt_n[row0 + r]>
    txt_diag = txtn_ref[pl.ds(row0, tb), :]                             # (tb, D)
    dlogit = jnp.sum(img_mm.astype(jnp.float32) * txt_diag.astype(jnp.float32),
                     axis=1, keepdims=True)                             # (tb, 1)

    # similarity tile: NT matmul on the MXU (contract dim 1 of both operands)
    logits = lax.dot_general(img_mm, txtn_ref[...],
                             (((1,), (1,)), ((), ())),
                             preferred_element_type=jnp.float32)        # (tb, B)
    sim = jnp.exp(logits)

    # row-side negatives: full row sums minus the diagonal exp (no mask pass)
    row_neg = jnp.sum(sim, axis=1, keepdims=True) - jnp.exp(dlogit)     # (tb, 1)
    rlog_ref[...] += jnp.sum(jnp.log(row_neg), keepdims=True)           # (1, 1)
    dsum_ref[...] += jnp.sum(dlogit, keepdims=True)                     # (1, 1)

    # column-side negatives: diagonal zeroed with a broadcast compare, fused
    # into a single reduction (masked matrix consumed exactly once).
    lane = lax.broadcasted_iota(jnp.int32, (1, sim.shape[1]), 1)        # (1, B)
    rows = lax.broadcasted_iota(jnp.int32, (tb, 1), 0) + row0           # (tb, 1)
    col_ref[...] += jnp.sum(jnp.where(lane == rows, 0.0, sim),
                            axis=0, keepdims=True)                      # (1, B)

    # ---- last tile: only the column logs remain in the epilogue
    @pl.when(i == nt - 1)
    def _finalize():
        c_sum = jnp.sum(jnp.log(col_ref[...]), keepdims=True)           # (1, 1)
        out_ref[...] = -(2.0 * dsum_ref[...] - rlog_ref[...] - c_sum
                         ) * jnp.float32(1.0 / batch)


def _vmem_capacity_bytes():
    try:
        info = pltpu.get_tpu_info()
        cap = getattr(info, "vmem_capacity_bytes", None)
        if cap:
            return int(cap)
    except Exception:
        pass
    return 64 * 2**20  # conservative (v7x per-core VMEM)


def _estimate_vmem(b, d, tb, in_bytes, mm_bytes, needs_stage):
    return (b * d * mm_bytes                              # normalized text (resident)
            + (b * d * in_bytes if needs_stage else 0)    # optional staging buffer
            + 2 * tb * d * in_bytes                       # double-buffered image block
            + 3 * tb * b * 4                              # (tb, B) f32 temporaries
            + 2 * tb * d * 4                              # (tb, D) f32 temporaries
            + 16 * b + 8192)


def _pick_row_tile(b, d, in_bytes, mm_bytes, needs_stage, budget):
    # Cap the row tile at 256 (MXU-sized) and bound it so the (tb,B) f32
    # temporaries + residents fit the scoped-VMEM budget.  Fall back to the
    # whole batch (full-dim block is always legal) if no aligned divisor fits.
    if b <= 256:
        return b
    candidates = [t for t in (256, 128, 64, 32, 16, 8) if b % t == 0]
    if not candidates:
        return b
    for t in candidates:
        if _estimate_vmem(b, d, t, in_bytes, mm_bytes, needs_stage) <= budget:
            return t
    return candidates[-1]


def simclr_loss(image_embeds, text_embeds, temp, *, mxu_bf16=None):
    B, D = image_embeds.shape
    assert text_embeds.shape == (B, D)
    if text_embeds.dtype != image_embeds.dtype:
        text_embeds = text_embeds.astype(image_embeds.dtype)

    in_dtype = image_embeds.dtype
    if mxu_bf16 is None:
        mxu_bf16 = (jnp.dtype(in_dtype) == jnp.dtype(jnp.bfloat16))
    mm_dtype = jnp.bfloat16 if mxu_bf16 else jnp.float32
    needs_stage = jnp.dtype(in_dtype) != jnp.dtype(mm_dtype)

    in_bytes = jnp.dtype(in_dtype).itemsize
    mm_bytes = jnp.dtype(mm_dtype).itemsize

    cap = _vmem_capacity_bytes()
    usable = cap - max(8 * 2**20, cap // 8)     # ~56 MiB on v7x, ~112 MiB on 128 MiB parts

    tb = _pick_row_tile(B, D, in_bytes, mm_bytes, needs_stage, usable)
    nt = B // tb

    est = _estimate_vmem(B, D, tb, in_bytes, mm_bytes, needs_stage)
    vmem_limit = int(min(usable, max(32 * 2**20, 2 * est)))

    kernel = functools.partial(_simclr_kernel, temp=float(temp), batch=B)

    scratch_shapes = [
        pltpu.VMEM((B, D), mm_dtype),      # normalized text (MXU RHS), resident
        pltpu.VMEM((1, B), jnp.float32),   # off-diagonal column sums
        pltpu.VMEM((1, 1), jnp.float32),   # sum of diagonal logits
        pltpu.VMEM((1, 1), jnp.float32),   # sum of log(row off-diag sums)
        pltpu.SemaphoreType.DMA(()),       # text HBM->VMEM copy
    ]
    if needs_stage:                        # f32 inputs with bf16 MXU operands
        scratch_shapes.append(pltpu.VMEM((B, D), in_dtype))

    cost = pl.CostEstimate(
        flops=int(2 * B * B * D + 10 * B * D + 8 * B * B),
        transcendentals=int(B * B + 5 * B),
        bytes_accessed=int(in_bytes * 2 * B * D + 4),
    )

    out = pl.pallas_call(
        kernel,
        out_shape=jax.ShapeDtypeStruct((1, 1), jnp.float32),
        grid=(nt,),
        in_specs=[
            pl.BlockSpec((tb, D), lambda i: (i, 0)),     # image rows, tiled
            pl.BlockSpec(memory_space=pl.ANY),           # text stays in HBM, DMA'd once
        ],
        out_specs=pl.BlockSpec((1, 1), lambda i: (0, 0)),
        scratch_shapes=scratch_shapes,
        compiler_params=pltpu.CompilerParams(
            dimension_semantics=("arbitrary",),
            vmem_limit_bytes=vmem_limit,
        ),
        cost_estimate=cost,
    )(image_embeds, text_embeds)
    return out[0, 0]


def _reference_loss(image_embeds, text_embeds, temp):
    # pure-JAX reference mirroring the PyTorch forward
    x = image_embeds.astype(jnp.float32)
    y = text_embeds.astype(jnp.float32)

    def norm(v):
        n = jnp.sqrt(jnp.sum(v * v, axis=1, keepdims=True))
        return v / jnp.maximum(n, 1e-12)

    Bn = x.shape[0]
    sim = jnp.exp(jnp.matmul(norm(x), norm(y).T,
                             precision=lax.Precision.HIGHEST) / temp)
    eye = jnp.eye(Bn, dtype=sim.dtype)
    pos = jnp.diag(sim)
    neg = sim * (1.0 - eye)
    image_term = jnp.log(pos / neg.sum(0))
    text_term = jnp.log(pos / neg.T.sum(0))
    return -jnp.mean(image_term + text_term)


if __name__ == "__main__":
    key = jax.random.PRNGKey(0)
    k1, k2 = jax.random.split(key)
    B, D = 8, 32
    temp = 0.5
    image_embeds = jax.random.normal(k1, (B, D), dtype=jnp.float32)
    text_embeds = jax.random.normal(k2, (B, D), dtype=jnp.float32)

    loss = simclr_loss(image_embeds, text_embeds, temp)
    loss = jax.block_until_ready(loss)

    ref = _reference_loss(image_embeds, text_embeds, temp)
    assert jnp.allclose(loss, ref, rtol=1e-4, atol=1e-4), (loss, ref)

    print("KERNEL_OK")
</pallas_src>

<mosaic_0001>
module attributes {stable_mosaic.version = 11 : i64} {
  func.func @_simclr_kernel(%arg0: i32, %arg1: memref<8x32xf32, #tpu.memory_space<vmem>>, %arg2: memref<8x32xf32, #tpu.memory_space<any>>, %arg3: memref<1x1xf32, #tpu.memory_space<vmem>>, %arg4: memref<8x32xf32, #tpu.memory_space<vmem>>, %arg5: memref<1x8xf32, #tpu.memory_space<vmem>>, %arg6: memref<1x1xf32, #tpu.memory_space<vmem>>, %arg7: memref<1x1xf32, #tpu.memory_space<vmem>>, %arg8: memref<!tpu.dma_semaphore, #tpu.memory_space<semaphore_mem>>) attributes {dimension_semantics = [#tpu.dimension_semantics<arbitrary>], iteration_bounds = array<i64: 1>, scalar_prefetch = 0 : i64, scratch_operands = 5 : i64, tpu.core_type = #tpu.core_type<tc>, window_params = [{transform_indices = @transform_0, window_bounds = array<i64: 8, 32>}, {}, {pipeline_mode = #tpu.pipeline_mode<synchronous>, transform_indices = @transform_2, window_bounds = array<i64: 1, 1>}]} {
    %c0_i32 = arith.constant 0 : i32
    %0 = arith.cmpi eq, %arg0, %c0_i32 : i32
    %1 = arith.extui %0 : i1 to i32
    %cst = arith.constant 1.000000e-24 : f32
    %c0_i32_0 = arith.constant 0 : i32
    %2 = arith.cmpi ne, %1, %c0_i32_0 : i32
    scf.if %2 {
      tpu.enqueue_dma source(%arg2 : memref<8x32xf32, #tpu.memory_space<any>>) target(%arg4 : memref<8x32xf32, #tpu.memory_space<vmem>>) target_semaphore(%arg8 : memref<!tpu.dma_semaphore, #tpu.memory_space<semaphore_mem>>)
      tpu.wait_dma2 semaphore(%arg8 : memref<!tpu.dma_semaphore, #tpu.memory_space<semaphore_mem>>) src(%arg2 : memref<8x32xf32, #tpu.memory_space<any>>) dst(%arg4 : memref<8x32xf32, #tpu.memory_space<vmem>>)
      %c0_29 = arith.constant 0 : index
      %c0_30 = arith.constant 0 : index
      %62 = vector.load %arg4[%c0_29, %c0_30] : memref<8x32xf32, #tpu.memory_space<vmem>>, vector<8x32xf32>
      %63 = arith.mulf %62, %62 : vector<8x32xf32>
      %cst_31 = arith.constant dense<0.000000e+00> : vector<8xf32>
      %64 = vector.multi_reduction <add>, %63, %cst_31 [1] : vector<8x32xf32> to vector<8xf32>
      %65 = vector.shape_cast %64 : vector<8xf32> to vector<8x1xf32>
      %66 = vector.broadcast %cst : f32 to vector<8x1xf32>
      %67 = arith.maximumf %65, %66 : vector<8x1xf32>
      %68 = math.rsqrt %67 : vector<8x1xf32>
      %69 = vector.broadcast %68 : vector<8x1xf32> to vector<8x32xf32>
      %70 = arith.mulf %62, %69 : vector<8x32xf32>
      %c0_32 = arith.constant 0 : index
      %c0_33 = arith.constant 0 : index
      %71 = vector.load %arg4[%c0_32, %c0_33] : memref<8x32xf32, #tpu.memory_space<vmem>>, vector<8x32xf32>
      tpu.vector_store %arg4[%c0_32, %c0_33], %70 {strides = array<i32>} : memref<8x32xf32, #tpu.memory_space<vmem>>, vector<8x32xf32>,
      %cst_34 = arith.constant 0.000000e+00 : f32
      %72 = vector.broadcast %cst_34 : f32 to vector<1x8xf32>
      %c0_35 = arith.constant 0 : index
      %c0_36 = arith.constant 0 : index
      %73 = vector.load %arg5[%c0_35, %c0_36] : memref<1x8xf32, #tpu.memory_space<vmem>>, vector<1x8xf32>
      tpu.vector_store %arg5[%c0_35, %c0_36], %72 {strides = array<i32>} : memref<1x8xf32, #tpu.memory_space<vmem>>, vector<1x8xf32>,
      %cst_37 = arith.constant 0.000000e+00 : f32
      %74 = vector.broadcast %cst_37 : f32 to vector<1x1xf32>
      %c0_38 = arith.constant 0 : index
      %c0_39 = arith.constant 0 : index
      %75 = vector.load %arg6[%c0_38, %c0_39] : memref<1x1xf32, #tpu.memory_space<vmem>>, vector<1x1xf32>
      tpu.vector_store %arg6[%c0_38, %c0_39], %74 {strides = array<i32>} : memref<1x1xf32, #tpu.memory_space<vmem>>, vector<1x1xf32>,
      %cst_40 = arith.constant 0.000000e+00 : f32
      %76 = vector.broadcast %cst_40 : f32 to vector<1x1xf32>
      %c0_41 = arith.constant 0 : index
      %c0_42 = arith.constant 0 : index
      %77 = vector.load %arg7[%c0_41, %c0_42] : memref<1x1xf32, #tpu.memory_space<vmem>>, vector<1x1xf32>
      tpu.vector_store %arg7[%c0_41, %c0_42], %76 {strides = array<i32>} : memref<1x1xf32, #tpu.memory_space<vmem>>, vector<1x1xf32>,
    } else {
    }
    %c0 = arith.constant 0 : index
    %c0_1 = arith.constant 0 : index
    %3 = vector.load %arg1[%c0, %c0_1] : memref<8x32xf32, #tpu.memory_space<vmem>>, vector<8x32xf32>
    %4 = arith.mulf %3, %3 : vector<8x32xf32>
    %cst_2 = arith.constant dense<0.000000e+00> : vector<8xf32>
    %5 = vector.multi_reduction <add>, %4, %cst_2 [1] : vector<8x32xf32> to vector<8xf32>
    %6 = vector.shape_cast %5 : vector<8xf32> to vector<8x1xf32>
    %cst_3 = arith.constant 1.000000e-24 : f32
    %7 = vector.broadcast %cst_3 : f32 to vector<8x1xf32>
    %8 = arith.maximumf %6, %7 : vector<8x1xf32>
    %9 = math.rsqrt %8 : vector<8x1xf32>
    %cst_4 = arith.constant 2.000000e+00 : f32
    %10 = vector.broadcast %cst_4 : f32 to vector<8x1xf32>
    %11 = arith.mulf %9, %10 : vector<8x1xf32>
    %12 = vector.broadcast %11 : vector<8x1xf32> to vector<8x32xf32>
    %13 = arith.mulf %3, %12 : vector<8x32xf32>
    %c8_i32 = arith.constant 8 : i32
    %14 = arith.muli %arg0, %c8_i32 : i32
    %15 = tpu.assume_multiple %14, 8 : i32
    %16 = arith.index_cast %15 : i32 to index
    %c0_5 = arith.constant 0 : index
    %17 = vector.load %arg4[%16, %c0_5] : memref<8x32xf32, #tpu.memory_space<vmem>>, vector<8x32xf32>
    %18 = arith.mulf %13, %17 : vector<8x32xf32>
    %cst_6 = arith.constant dense<0.000000e+00> : vector<8xf32>
    %19 = vector.multi_reduction <add>, %18, %cst_6 [1] : vector<8x32xf32> to vector<8xf32>
    %20 = vector.shape_cast %19 : vector<8xf32> to vector<8x1xf32>
    %c0_7 = arith.constant 0 : index
    %c0_8 = arith.constant 0 : index
    %21 = vector.load %arg4[%c0_7, %c0_8] : memref<8x32xf32, #tpu.memory_space<vmem>>, vector<8x32xf32>
    %cst_9 = arith.constant dense<0.000000e+00> : vector<8x8xf32>
    %22 = tpu.matmul %13, %21, %cst_9 {dimension_numbers = #tpu.dot_dimension_numbers<[1], [1], [0], [0], [0, 0, 1, 0], [], []>} : vector<8x32xf32>, vector<8x32xf32>, vector<8x8xf32> -> vector<8x8xf32>
    %23 = math.exp %22 : vector<8x8xf32>
    %cst_10 = arith.constant dense<0.000000e+00> : vector<8xf32>
    %24 = vector.multi_reduction <add>, %23, %cst_10 [1] : vector<8x8xf32> to vector<8xf32>
    %25 = vector.shape_cast %24 : vector<8xf32> to vector<8x1xf32>
    %26 = math.exp %20 : vector<8x1xf32>
    %27 = arith.subf %25, %26 : vector<8x1xf32>
    %c0_11 = arith.constant 0 : index
    %c0_12 = arith.constant 0 : index
    %28 = vector.load %arg7[%c0_11, %c0_12] : memref<1x1xf32, #tpu.memory_space<vmem>>, vector<1x1xf32>
    %29 = math.log %27 : vector<8x1xf32>
    %30 = vector.shape_cast %29 : vector<8x1xf32> to vector<1x8x1xf32>
    %cst_13 = arith.constant dense<0.000000e+00> : vector<1xf32>
    %31 = vector.multi_reduction <add>, %30, %cst_13 [1, 2] : vector<1x8x1xf32> to vector<1xf32>
    %32 = vector.shape_cast %31 : vector<1xf32> to vector<1x1x1xf32>
    %33 = vector.extract %32[0, 0, 0] : f32 from vector<1x1x1xf32>
    %34 = vector.broadcast %33 : f32 to vector<1x1xf32>
    %35 = arith.addf %28, %34 : vector<1x1xf32>
    %c0_14 = arith.constant 0 : index
    %c0_15 = arith.constant 0 : index
    %36 = vector.load %arg7[%c0_14, %c0_15] : memref<1x1xf32, #tpu.memory_space<vmem>>, vector<1x1xf32>
    tpu.vector_store %arg7[%c0_14, %c0_15], %35 {strides = array<i32>} : memref<1x1xf32, #tpu.memory_space<vmem>>, vector<1x1xf32>,
    %c0_16 = arith.constant 0 : index
    %c0_17 = arith.constant 0 : index
    %37 = vector.load %arg6[%c0_16, %c0_17] : memref<1x1xf32, #tpu.memory_space<vmem>>, vector<1x1xf32>
    %38 = vector.shape_cast %20 : vector<8x1xf32> to vector<1x8x1xf32>
    %cst_18 = arith.constant dense<0.000000e+00> : vector<1xf32>
    %39 = vector.multi_reduction <add>, %38, %cst_18 [1, 2] : vector<1x8x1xf32> to vector<1xf32>
    %40 = vector.shape_cast %39 : vector<1xf32> to vector<1x1x1xf32>
    %41 = vector.extract %40[0, 0, 0] : f32 from vector<1x1x1xf32>
    %42 = vector.broadcast %41 : f32 to vector<1x1xf32>
    %43 = arith.addf %37, %42 : vector<1x1xf32>
    %c0_19 = arith.constant 0 : index
    %c0_20 = arith.constant 0 : index
    %44 = vector.load %arg6[%c0_19, %c0_20] : memref<1x1xf32, #tpu.memory_space<vmem>>, vector<1x1xf32>
    tpu.vector_store %arg6[%c0_19, %c0_20], %43 {strides = array<i32>} : memref<1x1xf32, #tpu.memory_space<vmem>>, vector<1x1xf32>,
    %45 = tpu.iota {dimensions = array<i32: 1>} : vector<1x8xi32>
    %46 = tpu.iota {dimensions = array<i32: 0>} : vector<8x1xi32>
    %47 = vector.broadcast %15 : i32 to vector<8x1xi32>
    %48 = arith.addi %46, %47 : vector<8x1xi32>
    %c0_21 = arith.constant 0 : index
    %c0_22 = arith.constant 0 : index
    %49 = vector.load %arg5[%c0_21, %c0_22] : memref<1x8xf32, #tpu.memory_space<vmem>>, vector<1x8xf32>
    %50 = vector.broadcast %45 : vector<1x8xi32> to vector<8x8xi32>
    %51 = vector.broadcast %48 : vector<8x1xi32> to vector<8x8xi32>
    %52 = arith.cmpi eq, %50, %51 : vector<8x8xi32>
    %cst_23 = arith.constant 0.000000e+00 : f32
    %53 = vector.broadcast %cst_23 : f32 to vector<8x8xf32>
    %54 = arith.select %52, %53, %23 : vector<8x8xi1>, vector<8x8xf32>
    %cst_24 = arith.constant dense<0.000000e+00> : vector<8xf32>
    %55 = vector.multi_reduction <add>, %54, %cst_24 [0] : vector<8x8xf32> to vector<8xf32>
    %56 = vector.shape_cast %55 : vector<8xf32> to vector<1x8xf32>
    %57 = arith.addf %49, %56 : vector<1x8xf32>
    %c0_25 = arith.constant 0 : index
    %c0_26 = arith.constant 0 : index
    %58 = vector.load %arg5[%c0_25, %c0_26] : memref<1x8xf32, #tpu.memory_space<vmem>>, vector<1x8xf32>
    tpu.vector_store %arg5[%c0_25, %c0_26], %57 {strides = array<i32>} : memref<1x8xf32, #tpu.memory_space<vmem>>, vector<1x8xf32>,
    %c0_i32_27 = arith.constant 0 : i32
    %59 = arith.cmpi eq, %arg0, %c0_i32_27 : i32
    %60 = arith.extui %59 : i1 to i32
    %c0_i32_28 = arith.constant 0 : i32
    %61 = arith.cmpi ne, %60, %c0_i32_28 : i32
    scf.if %61 {
      %c0_29 = arith.constant 0 : index
      %c0_30 = arith.constant 0 : index
      %62 = vector.load %arg5[%c0_29, %c0_30] : memref<1x8xf32, #tpu.memory_space<vmem>>, vector<1x8xf32>
      %63 = math.log %62 : vector<1x8xf32>
      %64 = vector.shape_cast %63 : vector<1x8xf32> to vector<1x1x8xf32>
      %cst_31 = arith.constant dense<0.000000e+00> : vector<1xf32>
      %65 = vector.multi_reduction <add>, %64, %cst_31 [1, 2] : vector<1x1x8xf32> to vector<1xf32>
      %66 = vector.shape_cast %65 : vector<1xf32> to vector<1x1x1xf32>
      %67 = vector.extract %66[0, 0, 0] : f32 from vector<1x1x1xf32>
      %68 = vector.broadcast %67 : f32 to vector<1x1xf32>
      %c0_32 = arith.constant 0 : index
      %c0_33 = arith.constant 0 : index
      %69 = vector.load %arg6[%c0_32, %c0_33] : memref<1x1xf32, #tpu.memory_space<vmem>>, vector<1x1xf32>
      %cst_34 = arith.constant 2.000000e+00 : f32
      %70 = vector.broadcast %cst_34 : f32 to vector<1x1xf32>
      %71 = arith.mulf %70, %69 : vector<1x1xf32>
      %c0_35 = arith.constant 0 : index
      %c0_36 = arith.constant 0 : index
      %72 = vector.load %arg7[%c0_35, %c0_36] : memref<1x1xf32, #tpu.memory_space<vmem>>, vector<1x1xf32>
      %73 = arith.subf %71, %72 : vector<1x1xf32>
      %74 = arith.subf %73, %68 : vector<1x1xf32>
      %cst_37 = arith.constant 0.000000e+00 : f32
      %75 = vector.broadcast %cst_37 : f32 to vector<1x1xf32>
      %76 = arith.subf %75, %74 : vector<1x1xf32>
      %cst_38 = arith.constant 1.250000e-01 : f32
      %77 = vector.broadcast %cst_38 : f32 to vector<1x1xf32>
      %78 = arith.mulf %76, %77 : vector<1x1xf32>
      %c0_39 = arith.constant 0 : index
      %c0_40 = arith.constant 0 : index
      %79 = vector.load %arg3[%c0_39, %c0_40] : memref<1x1xf32, #tpu.memory_space<vmem>>, vector<1x1xf32>
      tpu.vector_store %arg3[%c0_39, %c0_40], %78 {strides = array<i32>} : memref<1x1xf32, #tpu.memory_space<vmem>>, vector<1x1xf32>,
    } else {
    }
    return
  }
  func.func @transform_0(%arg0: i32) -> (i32, i32) {
    %c0_i32 = arith.constant 0 : i32
    %c0_i32_0 = arith.constant 0 : i32
    return %arg0, %c0_i32 : i32, i32
  }
  func.func @transform_2(%arg0: i32) -> (i32, i32) {
    %c0_i32 = arith.constant 0 : i32
    %c0_i32_0 = arith.constant 0 : i32
    %c0_i32_1 = arith.constant 0 : i32
    return %c0_i32, %c0_i32_0 : i32, i32
  }
}

</mosaic_0001>

<bundles_post_ra>
// kernel: tpu_custom_call.1
= control target key start
LH: loop header
LB: loop body
LE: loop exit
PB: predicated region body
PF: predicated region fallthrough
CT: control target
= control target key end

     0   :  { %7 = vsyncpa [#allocation8], 0  ;;  %s437_s0 = inlined_call_operand.hbm [shape: f32[8,32], index: 0, kind: input, shape index: {}]   ;;  %s438_s1 = inlined_call_operand.hbm [shape: f32[8,32], index: 1, kind: input, shape index: {}]   ;;  %s439_s2 = inlined_call_operand.hbm [shape: f32[1,1], index: 2, kind: output, shape index: {}]  }
   0x1   :  { %8 = vsyncpa [#allocation9], 0  ;;  %s360_s9 = smov [#allocation7]   ;;  %s288_s13 = scalar_lea.hbm %s437_s0, 128 }
   0x2   :  { %s15_s10 = sshll.u32 %s360_s9, 4  ;;  %p289_p0 = scmp.ne.s32.totalorder %s437_s0, %s288_s13  ;;  %s16_s10 = int_to_ptr.vmem [resolvable:$true] %s15_s10 }
   0x3   :  { %p292_p1 = scmp.lt.u32.totalorder %s288_s13, %s437_s0 }
   0x5   :  { %p294_p2 = pnand %p292_p1, %p289_p0 }
   0x7   :  { %297 = shalt.err (!%p294_p2)
}
   0x8   :  { %s298_s18 = scalar_lea.vmem %s16_s10, 128  ;;  %p303_p4 = scmp.lt.s32.totalorder %s16_s10, %s16_s10 }
   0x9   :  { %p299_p3 = scmp.ne.s32.totalorder %s16_s10, %s298_s18  ;;  %p304_p5 = scmp.lt.s32.totalorder %s298_s18, %s298_s18 }
   0xb   :  { %p305_p6 = por %p304_p5, %p303_p4 }
   0xd   :  { %p306_p7 = pnand %p305_p6, %p299_p3 }
   0xf   :  { %309 = shalt.err (!%p306_p7)
}
  0x10   :  { %18 = dma.hbm_to_vmem [thread:$0]  %s437_s0, 128, %s16_s10, [#allocation8]  }
  0x11   :  { %354 = dma.done.wait [#allocation8], 128  }
  0x12   :  { %355 = vsyncadd [#allocation8], 4294967168  ;;  %s361_s21 = smov [#allocation2]   ;;  %s310_s25 = scalar_lea.hbm %s438_s1, 128 }
  0x13   :  { %s33_s22 = sshll.u32 %s361_s21, 4  ;;  %p311_p8 = scmp.ne.s32.totalorder %s438_s1, %s310_s25  ;;  %s34_s22 = int_to_ptr.vmem [resolvable:$true] %s33_s22 }
  0x14   :  { %p314_p9 = scmp.lt.u32.totalorder %s310_s25, %s438_s1 }
  0x16   :  { %p316_p10 = pnand %p314_p9, %p311_p8 }
  0x18   :  { %319 = shalt.err (!%p316_p10)  }
  0x19   :  { %s320_s0 = scalar_lea.vmem %s34_s22, 128  ;;  %p325_p12 = scmp.lt.s32.totalorder %s34_s22, %s34_s22 }
  0x1a   :  { %p321_p11 = scmp.ne.s32.totalorder %s34_s22, %s320_s0  ;;  %p326_p13 = scmp.lt.s32.totalorder %s320_s0, %s320_s0 }
  0x1c   :  { %p327_p0 = por %p326_p13, %p325_p12 }
  0x1e   :  { %p328_p1 = pnand %p327_p0, %p321_p11 }
  0x20   :  { %331 = shalt.err (!%p328_p1)  }
  0x21   :  { %36 = dma.hbm_to_vmem [thread:$0]  %s438_s1, 128, %s34_s22, [#allocation6] }
  0x22   :  { %356 = dma.done.wait [#allocation6], 128 }
  0x23   :  { %357 = vsyncadd [#allocation6], 4294967168  ;;  %v40_v0 = vld [vmem:[#allocation2] sm:$0xff]  ;;  %vm42_vm0 = vcmask 261120   ;;  %v55_v1 = vld [vmem:[#allocation7] sm:$0xff]  ;;  %v362_v6 = vmov 0.0   ;;  %v190_v22 = vlaneseq }
  0x24   :  { %v41_v2 = vmul.f32 %v40_v0, %v40_v0  ;;  %v56_v3 = vmul.f32 %v55_v1, %v55_v1  ;;  %260 = vmatprep.subr.mxu0 %v362_v6  ;;  %vm363_vm1 = vmmov 0   ;;  %vm50_vm2 = vcmask 57344   ;;  %s364_s6 = smov [#allocation10]  }
  0x25   :  { %262 = vmatprep.mubr.msk.f32.mxu0 %vm363_vm1, %v362_v6  ;;  %51 = vst.msk [vmem:[#allocation3] sm:$0x1] %vm50_vm2, %v362_v6  ;;  %v191_v23 = vand.u32 127, %v190_v22  ;;  %v193_v24 = vshrl.u32 %v190_v22, 7  ;;  %vm151_vm3 = vcmask 64512   ;;  %vm161_vm5 = vcmask 7168  }
  0x26   :  { %v43_v4 = vsel %vm42_vm0, %v41_v2, 0.0  ;;  %v58_v5 = vsel %vm42_vm0, %v56_v3, 0.0  ;;  %vm52_vm6 = vcmask 0   ;;  %s240_s7 = sshll.u32 %s364_s6, 4  ;;  %s241_s7 = int_to_ptr.vmem [resolvable:$true] %s240_s7 }
  0x27   :  { %44 = vadd.xlane.f32.xlu0 %v43_v4  ;;  %vm197_vm4 = vcmp.eq.s32.totalorder %v191_v23, %v193_v24  ;;  %54 = vst.msk [vmem:[#allocation5] sm:$0x1] %vm52_vm6, %v362_v6  ;;  %53 = vst.msk [vmem:[#allocation4] sm:$0x1] %vm52_vm6, %v362_v6  ;;  %s332_s8 = scalar_lea.vmem %s241_s7, 16  ;;  %s336_s9 = scalar_lea.vmem %s241_s7, 32 }
  0x28   :  { %p333_p2 = scmp.ne.s32.totalorder %s241_s7, %s332_s8  ;;  %p337_p3 = scmp.lt.s32.totalorder %s241_s7, %s241_s7 }
  0x29   :  { %p338_p4 = scmp.lt.s32.totalorder %s336_s9, %s332_s8 }
  0x2b   :  { %59 = vadd.xlane.f32.xlu0 %v58_v5  ;;  %p339_p5 = por %p338_p4, %p337_p3 }
  0x2c   :  { %v196_v36 = vld [vmem:[#allocation3] sm:$0x1] }
  0x2d   :  { %p340_p6 = pnand %p339_p5, %p333_p2 }
  0xb4   :  { %v45_v7 = vpop.xlane.xlu0 %44 }
  0xb5   :  { %v46_v8 = vmax.f32 %v45_v7, 1e-24  ;;  %v158_v7 = vld [vmem:[#allocation5] sm:$0x1] }
  0xb7   :  { %276 = vrsqrt.f32 %v46_v8  ;;  %v176_v8 = vld [vmem:[#allocation4] sm:$0x1] }
  0xb8   :  { %v60_v9 = vpop.xlane.xlu0 %59 }
  0xb9   :  { %v61_v10 = vmax.f32 %v60_v9, 1e-24 }
  0xbb   :  { %278 = vrsqrt.f32 %v61_v10 }
  0xc1   :  { %v277_v11 = vpop.eup %276 }
  0xc2   :  { %v48_v12 = vmul.f32 %v277_v11, %v40_v0 }
  0xc4   :  { %49 = vst.msk [vmem:[#allocation2] sm:$0xff] %vm42_vm0, %v48_v12 }
  0xc5   :  { %v279_v13 = vpop.eup %278 }
  0xc6   :  { %v63_v14 = vmul.f32 2.0, %v279_v13 }
  0xc8   :  { %v64_v15 = vmul.f32 %v63_v14, %v55_v1 }
  0xcb   :  { %v72_v16 = vld [vmem:[#allocation2] sm:$0xff] }
  0xcc   :  { %261 = vmatpush3.xpose.msk.msra.mxu0 %vm42_vm0, %v72_v16  ;;  %v68_v17 = vmul.f32 %v72_v16, %v64_v15 }
  0xce   :  { %v69_v18 = vsel %vm42_vm0, %v68_v17, 0.0 }
  0xcf   :  { %263 = vmatmul.mubr.msk.f32.vlgmr.msra.gmra.mrb[0].mxu0 %vm42_vm0, %v64_v15  ;;  %70 = vadd.xlane.f32.xlu1 %v69_v18 }
 0x15c   :  { %v71_v28 = vpop.xlane.xlu1 %70 }
 0x15d   :  { %v177_v32 = vsel %vm161_vm5, %v71_v28, 0.0  ;;  %v155_v39 = vmul.f32 1.442695, %v71_v28 }
 0x1a2   :  { %v145_v19 = vpop.f32.mrb[0].mxu0 }
 0x1a3   :  { %v149_v20 = vmul.f32 1.442695, %v145_v19  ;;  %v264_v21 = vpop.f32.mrb[1].mxu0 }
 0x1a5   :  { %280 = vpow2.f32 %v149_v20 }
 0x1a6   :  { %282 = vpow2.f32 %v155_v39 }
 0x1af   :  { %v281_v25 = vpop.eup %280 }
 0x1b0   :  { %v152_v26 = vsel %vm151_vm3, %v281_v25, 0.0  ;;  %v198_v27 = vsel %vm197_vm4, 0.0, %v281_v25  ;;  %v283_v41 = vpop.eup %282 }
 0x1b1   :  { %v199_v29 = vsel %vm151_vm3, %v198_v27, 0.0  ;;  %153 = vadd.xlane.f32.xlu1 %v152_v26 }
 0x1b2   :  { %v200_v30 = vrot.slane %v199_v29, 4 }
 0x1b4   :  { %v201_v31 = vadd.f32 %v200_v30, %v199_v29 }
 0x1b5   :  { %178 = vadd.xlane.f32.xlu1 %v177_v32 }
 0x1b6   :  { %v202_v33 = vrot.slane %v201_v31, 2 }
 0x1b8   :  { %v203_v34 = vadd.f32 %v202_v33, %v201_v31 }
 0x1ba   :  { %v204_v35 = vrot.slane %v203_v34, 1 }
 0x1bc   :  { %v205_v37 = vadd.f32 %v204_v35, %v203_v34 }
 0x1be   :  { %v206_v38 = vadd.f32 %v205_v37, %v196_v36 }
 0x1c0   :  { %208 = vst.msk [vmem:[#allocation3] sm:$0x1] %vm50_vm2, %v206_v38 }
 0x1c7   :  { %v212_v40 = vld [vmem:[#allocation3] sm:$0x1] }
 0x1c8   :  { %284 = vlog2.f32 %v212_v40 }
 0x1d2   :  { %v285_v44 = vpop.eup %284 }
 0x1d3   :  { %v214_v48 = vmul.f32 0.6931472, %v285_v44 }
 0x1d5   :  { %v215_v49 = vsel %vm50_vm2, %v214_v48, 0.0 }
 0x23e   :  { %v154_v42 = vpop.xlane.xlu1 %153 }
 0x23f   :  { %v157_v43 = vsub.f32 %v154_v42, %v283_v41 }
 0x241   :  { %286 = vlog2.f32 %v157_v43 }
 0x242   :  { %v179_v50 = vpop.xlane.xlu1 %178 }
 0x243   :  { %v180_v51 = vrot.slane %v179_v50, 4 }
 0x245   :  { %v181_v52 = vadd.f32 %v180_v51, %v179_v50 }
 0x247   :  { %v182_v53 = vrot.slane %v181_v52, 2 }
 0x249   :  { %v183_v57 = vadd.f32 %v182_v53, %v181_v52 }
 0x24b   :  { %v287_v45 = vpop.eup %286  ;;  %v184_v63 = vrot.slane %v183_v57, 1 }
 0x24c   :  { %v160_v46 = vmul.f32 0.6931472, %v287_v45 }
 0x24d   :  { %v185_v4 = vadd.f32 %v184_v63, %v183_v57 }
 0x24e   :  { %v162_v47 = vsel %vm161_vm5, %v160_v46, 0.0 }
 0x24f   :  { %163 = vadd.xlane.f32.xlu0 %v162_v47 }
 0x253   :  { %216 = vadd.xlane.f32.xlu0 %v215_v49 }
 0x2dc   :  { %v164_v54 = vpop.xlane.xlu0 %163 }
 0x2dd   :  { %v165_v55 = vrot.slane %v164_v54, 4 }
 0x2df   :  { %v166_v56 = vadd.f32 %v165_v55, %v164_v54 }
 0x2e0   :  { %v217_v58 = vpop.xlane.xlu0 %216 }
 0x2e1   :  { %v167_v59 = vrot.slane %v166_v56, 2  ;;  %v218_v60 = vrot.slane %v217_v58, 4 }
 0x2e3   :  { %v219_v61 = vadd.f32 %v218_v60, %v217_v58  ;;  %v168_v62 = vadd.f32 %v167_v59, %v166_v56 }
 0x2e5   :  { %v220_v0 = vrot.slane %v219_v61, 2  ;;  %v169_v1 = vrot.slane %v168_v62, 1 }
 0x2e7   :  { %v221_v2 = vadd.f32 %v220_v0, %v219_v61  ;;  %v170_v3 = vadd.f32 %v169_v1, %v168_v62 }
 0x2e9   :  { %265 = vpush %v170_v3  ;;  %v222_v5 = vrot.slane %v221_v2, 1 }
 0x2ea   :  { %267 = vpush %v185_v4 }
 0x2eb   :  { %v223_v6 = vadd.f32 %v222_v5, %v221_v2 }
 0x2ed   :  { %269 = vpush %v223_v6 }
 0x31a   :  { %s266_s1 = spop %265 }
 0x31b   :  { %v172_v9 = vstv %s266_s1  ;;  %s268_s4 = spop %267 }
 0x31c   :  { %v173_v10 = vadd.f32 %v172_v9, %v158_v7  ;;  %v187_v11 = vstv %s268_s4 }
 0x31d   :  { %v188_v12 = vadd.f32 %v187_v11, %v176_v8 }
 0x31e   :  { %175 = vst.msk [vmem:[#allocation5] sm:$0x1] %vm52_vm6, %v173_v10  ;;  %s270_s5 = spop %269 }
 0x31f   :  { %189 = vst.msk [vmem:[#allocation4] sm:$0x1] %vm52_vm6, %v188_v12  ;;  %v225_v17 = vstv %s270_s5 }
 0x325   :  { %v228_v15 = vld [vmem:[#allocation5] sm:$0x1] }
 0x326   :  { %v226_v13 = vld [vmem:[#allocation4] sm:$0x1] }
 0x327   :  { %v227_v14 = vmul.f32 2.0, %v226_v13 }
 0x329   :  { %v229_v16 = vsub.f32 %v227_v14, %v228_v15 }
 0x32b   :  { %v230_v18 = vsub.f32 %v229_v16, %v225_v17 }
 0x32d   :  { %v231_v19 = vsub.f32 0.0, %v230_v18 }
 0x32f   :  { %v232_v20 = vmul.f32 0.125, %v231_v19 }
 0x331   :  { %233 = vst.msk [vmem:[#allocation10] sm:$0x1] %vm52_vm6, %v232_v20 }
 0x332   :  { %343 = shalt.err (!%p340_p6)
}
 0x333   :  { %s344_s12 = scalar_lea.hbm %s439_s2, 16 }
 0x334   :  { %p345_p7 = scmp.ne.s32.totalorder %s439_s2, %s344_s12  ;;  %p348_p8 = scmp.lt.u32.totalorder %s344_s12, %s439_s2 }
 0x336   :  { %p350_p9 = pnand %p348_p8, %p345_p7 }
 0x338   :  { %353 = shalt.err (!%p350_p9)
}
 0x339   :  { %243 = dma.vmem_to_hbm [thread:$0]  %s241_s7, 16, %s439_s2, [#allocation9]  }
 0x33a   :  { %358 = dma.done.wait [#allocation9], 16  }
 0x33b   :  { %359 = vsyncadd [#allocation9], 4294967280 }
 0x33c   :  { %247 = vsyncpa [#allocation8], 1 }
 0x33d   :  { %248 = vsyncpa [#allocation9], 1 }
 0x33e   :  { %249 = vsyncmov [#allocation6] }
 0x341   :  { %s250_s19 = vpop.sfrf %249 }
 0x342   :  { %p257_p10 = scmp.ne.s32.totalorder %s250_s19, 0 }
 0x344   :  { %254 = shalt.err (%p257_p10)  }

</bundles_post_ra>
